<compile_context>
chip_gen: v6e
topology: v6e:2x2x1
jax: 0.10.0
libtpu: 0.0.40
codegen_flags: <defaults>
</compile_context>

<pallas_src>
import jax
import jax.numpy as jnp
from jax.experimental import pallas as pl
from jax.experimental.pallas import tpu as pltpu

IN_FEATURES = 28 * 28   # 784 (already a multiple of 8 -> fine as a K dim)
H1_PAD = 128            # 120 -> 128
H2_PAD = 128            # 84  -> 128
OUT_PAD = 128           # 10  -> 128
OUT_FEATURES = 10

MAX_TILE_B = 1024       # (1024, 784) f32 x tile double-buffered ~6.4 MiB


def _round_up(n, m):
    return -(-n // m) * m


def _mlp_kernel(x_ref, w1_ref, b1_ref, w2_ref, b2_ref, w3_ref, b3_ref, o_ref):
    # Cast activations to bf16 in-kernel (operands bf16, accumulation f32).
    x = x_ref[...].astype(jnp.bfloat16)
    # fc1 + relu
    h1 = jnp.dot(x, w1_ref[...], preferred_element_type=jnp.float32)
    h1 = jnp.maximum(h1 + b1_ref[...], 0.0)
    # fc2 + relu
    h2 = jnp.dot(h1.astype(jnp.bfloat16), w2_ref[...],
                 preferred_element_type=jnp.float32)
    h2 = jnp.maximum(h2 + b2_ref[...], 0.0)
    # fc3 (no activation)
    out = jnp.dot(h2.astype(jnp.bfloat16), w3_ref[...],
                  preferred_element_type=jnp.float32)
    o_ref[...] = (out + b3_ref[...]).astype(o_ref.dtype)


def prepare_params(w1, b1, w2, b2, w3, b3):
    """One-time param prep.

    Weights are stored as (in, out) == PyTorch nn.Linear.weight.T, with only
    the *output* feature dims zero-padded to 128 lanes, and cast to bf16.
    Biases are (1, out_pad) and stay f32.
    """
    def pad2(a, rows, cols):
        return jnp.pad(a, ((0, rows - a.shape[0]), (0, cols - a.shape[1])))

    w1p = pad2(w1, IN_FEATURES, H1_PAD).astype(jnp.bfloat16)   # (784, 128)
    w2p = pad2(w2, H1_PAD, H2_PAD).astype(jnp.bfloat16)        # (128, 128)
    w3p = pad2(w3, H2_PAD, OUT_PAD).astype(jnp.bfloat16)       # (128, 128)
    b1p = pad2(b1, 1, H1_PAD).astype(jnp.float32)
    b2p = pad2(b2, 1, H2_PAD).astype(jnp.float32)
    b3p = pad2(b3, 1, OUT_PAD).astype(jnp.float32)
    return w1p, b1p, w2p, b2p, w3p, b3p


def mlp_forward(x, w1p, b1p, w2p, b2p, w3p, b3p):
    """x: (B, 1, 28, 28) or (B, 784), f32 or bf16. Returns (B, 10) float32."""
    x2d = x.reshape(-1, IN_FEATURES)   # == torch x.view(-1, 784); no pad, no cast
    b = x2d.shape[0]

    # Batch tiling: sublane-align, prefer >=2 grid steps (v7x has 2 TCs and the
    # batch axis is marked "parallel"), rows in multiples of 16 when possible.
    b_align = _round_up(b, 8)
    if b_align >= 32:
        tile_b = min(MAX_TILE_B, _round_up(pl.cdiv(b_align, 2), 16))
    else:
        tile_b = b_align
    grid_b = pl.cdiv(b, tile_b)   # partial last block is masked by Pallas

    fixed = lambda i: (0, 0)  # weights/biases: same block every step (VMEM-resident)
    out = pl.pallas_call(
        _mlp_kernel,
        out_shape=jax.ShapeDtypeStruct((b_align, OUT_PAD), jnp.float32),
        grid=(grid_b,),
        in_specs=[
            # 784 equals the full last dim of x2d -> legal despite not being a
            # multiple of 128; tile_b is a multiple of 8.
            pl.BlockSpec((tile_b, IN_FEATURES), lambda i: (i, 0)),
            pl.BlockSpec((IN_FEATURES, H1_PAD), fixed),
            pl.BlockSpec((1, H1_PAD), fixed),
            pl.BlockSpec((H1_PAD, H2_PAD), fixed),
            pl.BlockSpec((1, H2_PAD), fixed),
            pl.BlockSpec((H2_PAD, OUT_PAD), fixed),
            pl.BlockSpec((1, OUT_PAD), fixed),
        ],
        out_specs=pl.BlockSpec((tile_b, OUT_PAD), lambda i: (i, 0)),
        compiler_params=pltpu.CompilerParams(
            dimension_semantics=("parallel",),
            vmem_limit_bytes=32 * 1024 * 1024,  # covers big tiles on v5e's 16 MiB default
        ),
    )(x2d, w1p, b1p, w2p, b2p, w3p, b3p)

    # NOTE: weight/bias specs could use pipeline_mode=pl.Buffered(1) (constant
    # index_map); skipped as a negligible win to keep lowering maximally portable.
    return out[:b, :OUT_FEATURES]


def init_params(key):
    """Deterministic synthetic parameters with nn.Linear-style uniform init."""
    def linear(key, fan_in, fan_out):
        kw, kb = jax.random.split(key)
        bound = 1.0 / jnp.sqrt(fan_in)
        # stored as (in, out) == PyTorch weight.T
        w = jax.random.uniform(kw, (fan_in, fan_out), jnp.float32, -bound, bound)
        b = jax.random.uniform(kb, (1, fan_out), jnp.float32, -bound, bound)
        return w, b

    k1, k2, k3 = jax.random.split(key, 3)
    w1, b1 = linear(k1, 28 * 28, 120)
    w2, b2 = linear(k2, 120, 84)
    w3, b3 = linear(k3, 84, 10)
    return w1, b1, w2, b2, w3, b3


if __name__ == "__main__":
    key = jax.random.PRNGKey(0)
    k_params, k_x = jax.random.split(key)

    w1, b1, w2, b2, w3, b3 = init_params(k_params)
    params = prepare_params(w1, b1, w2, b2, w3, b3)

    # Small MNIST-like batch: NCHW (B=8, C=1, H=28, W=28)
    x = jax.random.normal(k_x, (8, 1, 28, 28), dtype=jnp.float32)

    out = jax.block_until_ready(mlp_forward(x, *params))
    assert out.shape == (8, 10)

    # Reference in plain JAX using the same bf16-operand / f32-accumulate
    # arithmetic as the kernel (intentional precision choice vs. f32 PyTorch).
    def dot_bf16(a, w):
        return jnp.dot(a.astype(jnp.bfloat16), w.astype(jnp.bfloat16),
                       preferred_element_type=jnp.float32)

    xf = x.reshape(-1, 28 * 28)
    ref = jnp.maximum(dot_bf16(xf, w1) + b1, 0.0)
    ref = jnp.maximum(dot_bf16(ref, w2) + b2, 0.0)
    ref = dot_bf16(ref, w3) + b3

    assert jnp.allclose(out, ref, atol=1e-2, rtol=1e-2), "mismatch vs reference"
    print("KERNEL_OK")
</pallas_src>

<mosaic_0001>
module attributes {stable_mosaic.version = 11 : i64} {
  func.func @_mlp_kernel(%arg0: i32, %arg1: memref<8x784xf32, #tpu.memory_space<vmem>>, %arg2: memref<784x128xbf16, #tpu.memory_space<vmem>>, %arg3: memref<1x128xf32, #tpu.memory_space<vmem>>, %arg4: memref<128x128xbf16, #tpu.memory_space<vmem>>, %arg5: memref<1x128xf32, #tpu.memory_space<vmem>>, %arg6: memref<128x128xbf16, #tpu.memory_space<vmem>>, %arg7: memref<1x128xf32, #tpu.memory_space<vmem>>, %arg8: memref<8x128xf32, #tpu.memory_space<vmem>>) attributes {dimension_semantics = [#tpu.dimension_semantics<parallel>], iteration_bounds = array<i64: 1>, scalar_prefetch = 0 : i64, scratch_operands = 0 : i64, tpu.core_type = #tpu.core_type<tc>, window_params = [{transform_indices = @transform_0, window_bounds = array<i64: 8, 784>}, {pipeline_mode = #tpu.pipeline_mode<synchronous>, transform_indices = @transform_1, window_bounds = array<i64: 784, 128>}, {pipeline_mode = #tpu.pipeline_mode<synchronous>, transform_indices = @transform_2, window_bounds = array<i64: 1, 128>}, {pipeline_mode = #tpu.pipeline_mode<synchronous>, transform_indices = @transform_3, window_bounds = array<i64: 128, 128>}, {pipeline_mode = #tpu.pipeline_mode<synchronous>, transform_indices = @transform_4, window_bounds = array<i64: 1, 128>}, {pipeline_mode = #tpu.pipeline_mode<synchronous>, transform_indices = @transform_5, window_bounds = array<i64: 128, 128>}, {pipeline_mode = #tpu.pipeline_mode<synchronous>, transform_indices = @transform_6, window_bounds = array<i64: 1, 128>}, {transform_indices = @transform_7, window_bounds = array<i64: 8, 128>}]} {
    %c0 = arith.constant 0 : index
    %c0_0 = arith.constant 0 : index
    %0 = vector.load %arg1[%c0, %c0_0] : memref<8x784xf32, #tpu.memory_space<vmem>>, vector<8x784xf32>
    %1 = arith.truncf %0 : vector<8x784xf32> to vector<8x784xbf16>
    %c0_1 = arith.constant 0 : index
    %c0_2 = arith.constant 0 : index
    %2 = vector.load %arg2[%c0_1, %c0_2] : memref<784x128xbf16, #tpu.memory_space<vmem>>, vector<784x128xbf16>
    %cst = arith.constant dense<0.000000e+00> : vector<8x128xf32>
    %3 = tpu.matmul %1, %2, %cst {dimension_numbers = #tpu.dot_dimension_numbers<[1], [0], [0], [1], [0, 0, 1, 1], [], []>} : vector<8x784xbf16>, vector<784x128xbf16>, vector<8x128xf32> -> vector<8x128xf32>
    %c0_3 = arith.constant 0 : index
    %c0_4 = arith.constant 0 : index
    %4 = vector.load %arg3[%c0_3, %c0_4] : memref<1x128xf32, #tpu.memory_space<vmem>>, vector<1x128xf32>
    %5 = vector.broadcast %4 : vector<1x128xf32> to vector<8x128xf32>
    %6 = arith.addf %3, %5 : vector<8x128xf32>
    %cst_5 = arith.constant 0.000000e+00 : f32
    %7 = vector.broadcast %cst_5 : f32 to vector<8x128xf32>
    %8 = arith.maximumf %6, %7 : vector<8x128xf32>
    %9 = arith.truncf %8 : vector<8x128xf32> to vector<8x128xbf16>
    %c0_6 = arith.constant 0 : index
    %c0_7 = arith.constant 0 : index
    %10 = vector.load %arg4[%c0_6, %c0_7] : memref<128x128xbf16, #tpu.memory_space<vmem>>, vector<128x128xbf16>
    %cst_8 = arith.constant dense<0.000000e+00> : vector<8x128xf32>
    %11 = tpu.matmul %9, %10, %cst_8 {dimension_numbers = #tpu.dot_dimension_numbers<[1], [0], [0], [1], [0, 0, 1, 1], [], []>} : vector<8x128xbf16>, vector<128x128xbf16>, vector<8x128xf32> -> vector<8x128xf32>
    %c0_9 = arith.constant 0 : index
    %c0_10 = arith.constant 0 : index
    %12 = vector.load %arg5[%c0_9, %c0_10] : memref<1x128xf32, #tpu.memory_space<vmem>>, vector<1x128xf32>
    %13 = vector.broadcast %12 : vector<1x128xf32> to vector<8x128xf32>
    %14 = arith.addf %11, %13 : vector<8x128xf32>
    %cst_11 = arith.constant 0.000000e+00 : f32
    %15 = vector.broadcast %cst_11 : f32 to vector<8x128xf32>
    %16 = arith.maximumf %14, %15 : vector<8x128xf32>
    %17 = arith.truncf %16 : vector<8x128xf32> to vector<8x128xbf16>
    %c0_12 = arith.constant 0 : index
    %c0_13 = arith.constant 0 : index
    %18 = vector.load %arg6[%c0_12, %c0_13] : memref<128x128xbf16, #tpu.memory_space<vmem>>, vector<128x128xbf16>
    %cst_14 = arith.constant dense<0.000000e+00> : vector<8x128xf32>
    %19 = tpu.matmul %17, %18, %cst_14 {dimension_numbers = #tpu.dot_dimension_numbers<[1], [0], [0], [1], [0, 0, 1, 1], [], []>} : vector<8x128xbf16>, vector<128x128xbf16>, vector<8x128xf32> -> vector<8x128xf32>
    %c0_15 = arith.constant 0 : index
    %c0_16 = arith.constant 0 : index
    %20 = vector.load %arg7[%c0_15, %c0_16] : memref<1x128xf32, #tpu.memory_space<vmem>>, vector<1x128xf32>
    %21 = vector.broadcast %20 : vector<1x128xf32> to vector<8x128xf32>
    %22 = arith.addf %19, %21 : vector<8x128xf32>
    %c0_17 = arith.constant 0 : index
    %c0_18 = arith.constant 0 : index
    %23 = vector.load %arg8[%c0_17, %c0_18] : memref<8x128xf32, #tpu.memory_space<vmem>>, vector<8x128xf32>
    tpu.vector_store %arg8[%c0_17, %c0_18], %22 {strides = array<i32>} : memref<8x128xf32, #tpu.memory_space<vmem>>, vector<8x128xf32>,
    return
  }
  func.func @transform_0(%arg0: i32) -> (i32, i32) {
    %c0_i32 = arith.constant 0 : i32
    %c0_i32_0 = arith.constant 0 : i32
    return %arg0, %c0_i32 : i32, i32
  }
  func.func @transform_1(%arg0: i32) -> (i32, i32) {
    %c0_i32 = arith.constant 0 : i32
    %c0_i32_0 = arith.constant 0 : i32
    %c0_i32_1 = arith.constant 0 : i32
    return %c0_i32, %c0_i32_0 : i32, i32
  }
  func.func @transform_2(%arg0: i32) -> (i32, i32) {
    %c0_i32 = arith.constant 0 : i32
    %c0_i32_0 = arith.constant 0 : i32
    %c0_i32_1 = arith.constant 0 : i32
    return %c0_i32, %c0_i32_0 : i32, i32
  }
  func.func @transform_3(%arg0: i32) -> (i32, i32) {
    %c0_i32 = arith.constant 0 : i32
    %c0_i32_0 = arith.constant 0 : i32
    %c0_i32_1 = arith.constant 0 : i32
    return %c0_i32, %c0_i32_0 : i32, i32
  }
  func.func @transform_4(%arg0: i32) -> (i32, i32) {
    %c0_i32 = arith.constant 0 : i32
    %c0_i32_0 = arith.constant 0 : i32
    %c0_i32_1 = arith.constant 0 : i32
    return %c0_i32, %c0_i32_0 : i32, i32
  }
  func.func @transform_5(%arg0: i32) -> (i32, i32) {
    %c0_i32 = arith.constant 0 : i32
    %c0_i32_0 = arith.constant 0 : i32
    %c0_i32_1 = arith.constant 0 : i32
    return %c0_i32, %c0_i32_0 : i32, i32
  }
  func.func @transform_6(%arg0: i32) -> (i32, i32) {
    %c0_i32 = arith.constant 0 : i32
    %c0_i32_0 = arith.constant 0 : i32
    %c0_i32_1 = arith.constant 0 : i32
    return %c0_i32, %c0_i32_0 : i32, i32
  }
  func.func @transform_7(%arg0: i32) -> (i32, i32) {
    %c0_i32 = arith.constant 0 : i32
    %c0_i32_0 = arith.constant 0 : i32
    return %arg0, %c0_i32 : i32, i32
  }
}

</mosaic_0001>

<bundles_post_ra>
// kernel: tpu_custom_call.1
= control target key start
LH: loop header
LB: loop body
LE: loop exit
PB: predicated region body
PF: predicated region fallthrough
CT: control target
= control target key end

     0   :  { %12 = vsyncpa [#allocation3], 0  ;;  %s1390_s0 = inlined_call_operand.hbm [shape: f32[8,784], index: 0, kind: input, shape index: {}]   ;;  %s1391_s1 = inlined_call_operand.hbm [shape: bf16[784,128], index: 1, kind: input, shape index: {}]   ;;  %s1392_s2 = inlined_call_operand.vmem [shape: f32[1,128], index: 2, kind: input, shape index: {}]   ;;  %s1393_s3 = inlined_call_operand.hbm [shape: bf16[128,128], index: 3, kind: input, shape index: {}]   ;;  %s1394_s4 = inlined_call_operand.vmem [shape: f32[1,128], index: 4, kind: input, shape index: {}]   ;;  %s1395_s5 = inlined_call_operand.hbm [shape: bf16[128,128], index: 5, kind: input, shape index: {}]   ;;  %s1396_s6 = inlined_call_operand.vmem [shape: f32[1,128], index: 6, kind: input, shape index: {}]   ;;  %s1397_s7 = inlined_call_operand.hbm [shape: f32[8,128], index: 7, kind: output, shape index: {}]  }
   0x1   :  { %13 = vsyncpa [#allocation6], 0 }
   0x2   :  { %14 = vsyncpa [#allocation9], 0 }
   0x3   :  { %15 = vsyncpa [#allocation4], 0  ;;  %s1285_s24 = smov [#allocation5]  }
   0x4   :  { %s31_s25 = sshll.u32 %s1285_s24, 4  ;;  %s32_s25 = int_to_ptr.vmem [resolvable:$true] %s31_s25 }
   0x5   :  { %s1185_s26 = scalar_lea.vmem %s32_s25, 6272  ;;  %p1190_p1 = scmp.lt.s32.totalorder %s32_s25, %s32_s25 }
   0x6   :  { %p1186_p0 = scmp.ne.s32.totalorder %s32_s25, %s1185_s26  ;;  %p1191_p2 = scmp.lt.s32.totalorder %s1185_s26, %s1185_s26 }
   0x8   :  { %p1192_p3 = por %p1191_p2, %p1190_p1 }
   0xa   :  { %p1193_p4 = pnand %p1192_p3, %p1186_p0 }
   0xc   :  { %1196 = shalt.err (!%p1193_p4)
}
   0xd   :  { %s1286_s27 = smov 64   ;;  %s1287_s28 = smov 4  }
   0xe   :  { %37 = dma.hbm_to_vmem [thread:$0]  %s1391_s1, 6272, %s32_s25, [#allocation6], %s1286_s27, %s1286_s27, %s1287_s28  }
   0xf   :  { %s1288_s8 = smov [#allocation2]   ;;  %s1289_s10 = smov [#allocation7]  }
  0x10   :  { %s22_s9 = sshll.u32 %s1288_s8, 4  ;;  %s45_s11 = sshll.u32 %s1289_s10, 4  ;;  %s23_s9 = int_to_ptr.vmem [resolvable:$true] %s22_s9  ;;  %s46_s11 = int_to_ptr.vmem [resolvable:$true] %s45_s11 }
  0x11   :  { %s1205_s12 = scalar_lea.vmem %s23_s9, 896  ;;  %p1210_p6 = scmp.lt.s32.totalorder %s23_s9, %s23_s9 }
  0x12   :  { %p1206_p5 = scmp.ne.s32.totalorder %s23_s9, %s1205_s12  ;;  %p1211_p7 = scmp.lt.s32.totalorder %s1205_s12, %s1205_s12 }
  0x14   :  { %p1212_p8 = por %p1211_p7, %p1210_p6 }
  0x16   :  { %p1213_p9 = pnand %p1212_p8, %p1206_p5 }
  0x18   :  { %1216 = shalt.err (!%p1213_p9)
}
  0x19   :  { %25 = dma.hbm_to_vmem [thread:$0]  %s1390_s0, 896, %s23_s9, [#allocation3]  }
  0x1a   :  { %s1225_s15 = scalar_lea.vmem %s46_s11, 1024  ;;  %p1230_p11 = scmp.lt.s32.totalorder %s46_s11, %s46_s11 }
  0x1b   :  { %p1226_p10 = scmp.ne.s32.totalorder %s46_s11, %s1225_s15  ;;  %p1231_p12 = scmp.lt.s32.totalorder %s1225_s15, %s1225_s15 }
  0x1d   :  { %p1232_p13 = por %p1231_p12, %p1230_p11 }
  0x1f   :  { %p1233_p0 = pnand %p1232_p13, %p1226_p10 }
  0x21   :  { %1236 = shalt.err (!%p1233_p0)
}
  0x22   :  { %51 = dma.hbm_to_vmem [thread:$0]  %s1393_s3, 1024, %s46_s11, [#allocation6], %s1286_s27, %s1286_s27, %s1287_s28  }
  0x23   :  { %s1290_s17 = smov [#allocation8]  }
  0x24   :  { %s59_s18 = sshll.u32 %s1290_s17, 4  ;;  %s60_s18 = int_to_ptr.vmem [resolvable:$true] %s59_s18 }
  0x25   :  { %s1245_s19 = scalar_lea.vmem %s60_s18, 1024  ;;  %p1250_p2 = scmp.lt.s32.totalorder %s60_s18, %s60_s18 }
  0x26   :  { %p1246_p1 = scmp.ne.s32.totalorder %s60_s18, %s1245_s19  ;;  %p1251_p3 = scmp.lt.s32.totalorder %s1245_s19, %s1245_s19 }
  0x28   :  { %p1252_p4 = por %p1251_p3, %p1250_p2 }
  0x2a   :  { %p1253_p5 = pnand %p1252_p4, %p1246_p1 }
  0x2c   :  { %1256 = shalt.err (!%p1253_p5)
}
  0x2d   :  { %65 = dma.hbm_to_vmem [thread:$0]  %s1395_s5, 1024, %s60_s18, [#allocation9], %s1286_s27, %s1286_s27, %s1287_s28  }
  0x2e   :  { %1277 = dma.done.wait [#allocation3], 896  }
  0x2f   :  { %1278 = vsyncadd [#allocation3], 4294966400 }
  0x30   :  { %1279 = dma.done.wait [#allocation6], 7296  }
  0x31   :  { %1280 = vsyncadd [#allocation6], 4294960000 }
  0x32   :  { %1281 = dma.done.wait [#allocation9], 1024  }
  0x33   :  { %1282 = vsyncadd [#allocation9], 4294966272  ;;  %v1112_v0 = vld [vmem:[#allocation5 + $0x78] sm:$0xff]   ;;  %v1116_v4 = vld [vmem:[#allocation5 + $0x70] sm:$0xff]   ;;  %v1291_v44 = vmov 0.0   ;;  %vm1292_vm0 = vmmov 0  }
  0x34   :  { %v1113_v1 = vld [vmem:[#allocation5 + $0x38] sm:$0xff]   ;;  %971 = vmatprep.subr.bf16.mxu0 %v1112_v0  ;;  %v1117_v5 = vld [vmem:[#allocation5 + $0x30] sm:$0xff]   ;;  %v1120_v8 = vld [vmem:[#allocation5 + $0x68] sm:$0xff]   ;;  %vm494_vm1 = vcmask 130048   ;;  %s1293_s24 = smov [#allocation10]  }
  0x35   :  { %v1114_v2 = vld [vmem:[#allocation5 + $0xf8] sm:$0xff]   ;;  %972 = vmatpush3.bf16.msra.mxu0 %v1113_v1  ;;  %v1118_v6 = vld [vmem:[#allocation5 + $0xf0] sm:$0xff]   ;;  %v1121_v9 = vld [vmem:[#allocation5 + $0x28] sm:$0xff]   ;;  %s891_s25 = sshll.u32 %s1293_s24, 4  ;;  %s892_s25 = int_to_ptr.vmem [resolvable:$true] %s891_s25 }
  0x36   :  { %v1115_v3 = vld [vmem:[#allocation5 + $0xb8] sm:$0xff]   ;;  %993 = vmatprep.subr.bf16.mxu1 %v1114_v2  ;;  %973 = vmatprep.subr.bf16.mxu0 %v1116_v4  ;;  %v1119_v7 = vld [vmem:[#allocation5 + $0xb0] sm:$0xff]   ;;  %v1122_v10 = vld [vmem:[#allocation5 + $0xe8] sm:$0xff]   ;;  %p1262_p7 = scmp.lt.s32.totalorder %s892_s25, %s892_s25 }
  0x37   :  { %994 = vmatpush3.bf16.msra.mxu1 %v1115_v3  ;;  %v1123_v11 = vld [vmem:[#allocation5 + $0xa8] sm:$0xff]   ;;  %v1124_v12 = vld [vmem:[#allocation5 + $0x60] sm:$0xff]   ;;  %v1128_v16 = vld [vmem:[#allocation5 + $0x58] sm:$0xff]  }
  0x38   :  { %995 = vmatprep.subr.bf16.mxu1 %v1118_v6  ;;  %v1125_v13 = vld [vmem:[#allocation5 + $0x20] sm:$0xff]   ;;  %v1129_v17 = vld [vmem:[#allocation5 + $0x18] sm:$0xff]   ;;  %v1132_v20 = vld [vmem:[#allocation5 + $0x50] sm:$0xff]  }
  0x39   :  { %974 = vmatpush3.bf16.msra.mxu0 %v1117_v5  ;;  %v1126_v14 = vld [vmem:[#allocation5 + $0xe0] sm:$0xff]   ;;  %v1130_v18 = vld [vmem:[#allocation5 + $0xd8] sm:$0xff]   ;;  %v1133_v21 = vld [vmem:[#allocation5 + $0x10] sm:$0xff]  }
  0x3a   :  { %975 = vmatprep.subr.bf16.mxu0 %v1120_v8  ;;  %v1127_v15 = vld [vmem:[#allocation5 + $0xa0] sm:$0xff]   ;;  %v1131_v19 = vld [vmem:[#allocation5 + $0x98] sm:$0xff]   ;;  %v1134_v22 = vld [vmem:[#allocation5 + $0xd0] sm:$0xff]  }
  0x3b   :  { %996 = vmatpush3.bf16.msra.mxu1 %v1119_v7  ;;  %v1135_v23 = vld [vmem:[#allocation5 + $0x90] sm:$0xff]   ;;  %v1136_v24 = vld [vmem:[#allocation5 + $0x48] sm:$0xff]   ;;  %v1140_v28 = vld [vmem:[#allocation5 + $0x40] sm:$0xff]  }
  0x3c   :  { %997 = vmatprep.subr.bf16.mxu1 %v1122_v10  ;;  %v1137_v25 = vld [vmem:[#allocation5 + $0x8] sm:$0xff]   ;;  %v1141_v29 = vld [vmem:[#allocation5] sm:$0xff]   ;;  %v82_v31 = vld [vmem:[#allocation2 + $0x8] sm:$0xff] }
  0x3d   :  { %976 = vmatpush3.bf16.msra.mxu0 %v1121_v9  ;;  %v1138_v26 = vld [vmem:[#allocation5 + $0xc8] sm:$0xff]   ;;  %v1142_v30 = vld [vmem:[#allocation5 + $0xc0] sm:$0xff]   ;;  %v89_v32 = vpack.c.bf16 %v82_v31, %v82_v31  ;;  %v1144_v36 = vld [vmem:[#allocation5 + $0x178] sm:$0xff]  }
  0x3e   :  { %977 = vmatprep.subr.bf16.mxu0 %v1124_v12  ;;  %v1139_v27 = vld [vmem:[#allocation5 + $0x88] sm:$0xff]   ;;  %v1143_v33 = vld [vmem:[#allocation5 + $0x80] sm:$0xff]   ;;  %v1145_v39 = vld [vmem:[#allocation5 + $0x138] sm:$0xff]  }
  0x3f   :  { %998 = vmatpush3.bf16.msra.mxu1 %v1123_v11  ;;  %v81_v34 = vld [vmem:[#allocation2] sm:$0xff]  ;;  %v84_v37 = vld [vmem:[#allocation2 + $0x18] sm:$0xff]  ;;  %530 = vmatprep.mubr.bf16.mxu0 %v89_v32  ;;  %v83_v40 = vld [vmem:[#allocation2 + $0x10] sm:$0xff] }
  0x40   :  { %999 = vmatprep.subr.bf16.mxu1 %v1126_v14  ;;  %v88_v35 = vpack.c.bf16 %v81_v34, %v81_v34  ;;  %v91_v38 = vpack.c.bf16 %v84_v37, %v84_v37  ;;  %v90_v41 = vpack.c.bf16 %v83_v40, %v83_v40  ;;  %v1146_v42 = vld [vmem:[#allocation5 + $0x170] sm:$0xff]   ;;  %v1148_v45 = vld [vmem:[#allocation5 + $0x168] sm:$0xff]   ;;  %v1150_v47 = vld [vmem:[#allocation5 + $0x160] sm:$0xff]  }
  0x41   :  { %978 = vmatpush3.bf16.msra.mxu0 %v1125_v13  ;;  %v1147_v43 = vld [vmem:[#allocation5 + $0x130] sm:$0xff]   ;;  %v1149_v46 = vld [vmem:[#allocation5 + $0x128] sm:$0xff]   ;;  %v1151_v48 = vld [vmem:[#allocation5 + $0x120] sm:$0xff]  }
  0x42   :  { %979 = vmatprep.subr.bf16.mxu0 %v1128_v16  ;;  %570 = vmatprep.mubr.bf16.mxu1 %v91_v38  ;;  %v1152_v49 = vld [vmem:[#allocation5 + $0x158] sm:$0xff]   ;;  %v1154_v51 = vld [vmem:[#allocation5 + $0x150] sm:$0xff]   ;;  %v1160_v53 = vld [vmem:[#allocation5 + $0x180] sm:$0xff]  }
  0x43   :  { %1000 = vmatpush3.bf16.msra.mxu1 %v1127_v15  ;;  %v1153_v50 = vld [vmem:[#allocation5 + $0x118] sm:$0xff]   ;;  %v1155_v52 = vld [vmem:[#allocation5 + $0x110] sm:$0xff]   ;;  %v1156_v55 = vld [vmem:[#allocation5 + $0x148] sm:$0xff]  }
  0x44   :  { %1001 = vmatprep.subr.bf16.mxu1 %v1130_v18  ;;  %v86_v54 = vld [vmem:[#allocation2 + $0x28] sm:$0xff]  ;;  %v87_v57 = vld [vmem:[#allocation2 + $0x30] sm:$0xff]  ;;  %v1157_v59 = vld [vmem:[#allocation5 + $0x108] sm:$0xff]  }
  0x45   :  { %980 = vmatpush3.bf16.msra.mxu0 %v1129_v17  ;;  %v93_v56 = vpack.c.bf16 %v86_v54, %v86_v54  ;;  %v94_v58 = vpack.c.bf16 %v87_v57, %v87_v57  ;;  %v1158_v60 = vld [vmem:[#allocation5 + $0x140] sm:$0xff]   ;;  %v85_v62 = vld [vmem:[#allocation2 + $0x20] sm:$0xff]  ;;  %v1162_v1 = vld [vmem:[#allocation7 + $0x30] sm:$0xff]  }
  0x46   :  { %981 = vmatprep.subr.bf16.mxu0 %v1132_v20  ;;  %v1159_v61 = vld [vmem:[#allocation5 + $0x100] sm:$0xff]   ;;  %v92_v63 = vpack.c.bf16 %v85_v62, %v85_v62  ;;  %v1163_v2 = vld [vmem:[#allocation7 + $0x28] sm:$0xff]   ;;  %v1164_v3 = vld [vmem:[#allocation7 + $0x20] sm:$0xff]  }
  0x47   :  { %1002 = vmatpush3.bf16.msra.mxu1 %v1131_v19  ;;  %v1161_v0 = vld [vmem:[#allocation7 + $0x38] sm:$0xff]   ;;  %v1166_v5 = vld [vmem:[#allocation7 + $0x10] sm:$0xff]   ;;  %v1167_v6 = vld [vmem:[#allocation7 + $0x8] sm:$0xff]  }
  0x48   :  { %1003 = vmatprep.subr.bf16.mxu1 %v1134_v22  ;;  %v1165_v4 = vld [vmem:[#allocation7 + $0x18] sm:$0xff]   ;;  %v1168_v7 = vld [vmem:[#allocation7] sm:$0xff]   ;;  %v1170_v9 = vld [vmem:[#allocation8 + $0x30] sm:$0xff]  }
  0x49   :  { %982 = vmatpush3.bf16.msra.mxu0 %v1133_v21  ;;  %v1169_v8 = vld [vmem:[#allocation8 + $0x38] sm:$0xff]   ;;  %v1171_v10 = vld [vmem:[#allocation8 + $0x28] sm:$0xff]   ;;  %v1172_v11 = vld [vmem:[#allocation8 + $0x20] sm:$0xff]  }
  0x4a   :  { %983 = vmatprep.subr.bf16.mxu0 %v1136_v24  ;;  %v1173_v12 = vld [vmem:[#allocation8 + $0x18] sm:$0xff]   ;;  %v1174_v13 = vld [vmem:[#allocation8 + $0x10] sm:$0xff]   ;;  %v1175_v40 = vld [vmem:[#allocation8 + $0x8] sm:$0xff]  }
  0x4b   :  { %1004 = vmatpush3.bf16.msra.mxu1 %v1135_v23 }
  0x4c   :  { %1005 = vmatprep.subr.bf16.mxu1 %v1138_v26 }
  0x4d   :  { %984 = vmatpush3.bf16.msra.mxu0 %v1137_v25 }
  0x4e   :  { %985 = vmatprep.subr.bf16.mxu0 %v1140_v28 }
  0x4f   :  { %1006 = vmatpush3.bf16.msra.mxu1 %v1139_v27  ;;  %v902_v27 = vld [vmem:[%s1392_s2] ss:$0 sm:$0xff] }
  0x50   :  { %1007 = vmatprep.subr.bf16.mxu1 %v1142_v30 }
  0x51   :  { %986 = vmatpush3.bf16.msra.mxu0 %v1141_v29 }
  0x52   :  { %1015 = vmatprep.subr.bf16.mxu0 %v1144_v36 }
  0x53   :  { %1008 = vmatpush3.bf16.msra.mxu1 %v1143_v33 }
  0x54   :  { %531 = vmatmul.mubr.bf16.vlgmr.msra.gmra.mxu0 %v88_v35  ;;  %1057 = vmatprep.subr.bf16.mxu1 %v1291_v44 }
  0x55   :  { %1016 = vmatpush3.bf16.msra.mxu0 %v1145_v39  ;;  %610 = vmatprep.mubr.bf16.mxu0 %v93_v56 }
  0x56   :  { %571 = vmatmul.mubr.bf16.vlgmr.msra.gmra.mxu1 %v90_v41  ;;  %1017 = vmatprep.subr.bf16.mxu0 %v1146_v42  ;;  %v1176_v41 = vld [vmem:[#allocation8] sm:$0xff]  }
  0x57   :  { %1059 = vmatprep.mubr.msk.bf16.mxu1 %vm1292_vm0, %v1291_v44  ;;  %1058 = vmatpush3.bf16.msra.mxu1 %v1160_v53  ;;  %v953_v42 = vld [vmem:[%s1394_s4] ss:$0 sm:$0xff]  ;;  %s1257_s4 = scalar_lea.vmem %s892_s25, 128 }
  0x58   :  { %1063 = vmatprep.subr.bf16.mxu1 %v1291_v44  ;;  %p1258_p6 = scmp.ne.s32.totalorder %s892_s25, %s1257_s4  ;;  %p1263_p8 = scmp.lt.s32.totalorder %s1257_s4, %s1257_s4 }
  0x59   :  { %1018 = vmatpush3.bf16.msra.mxu0 %v1147_v43 }
  0x5a   :  { %1019 = vmatprep.subr.bf16.mxu0 %v1148_v45  ;;  %p1264_p9 = por %p1263_p8, %p1262_p7 }
  0x5c   :  { %p1265_p10 = pnand %p1264_p9, %p1258_p6 }
  0x5d   :  { %1020 = vmatpush3.bf16.msra.mxu0 %v1149_v46 }
  0x5e   :  { %1021 = vmatprep.subr.bf16.mxu0 %v1150_v47  ;;  %1060 = vmatmul.mubr.msk.bf16.vlgmr.msra.gmra.mxu1 %vm494_vm1, %v94_v58 }
  0x5f   :  { %1079 = vmatprep.mubr.msk.bf16.mxu1 %vm1292_vm0, %v1291_v44  ;;  %1064 = vmatpush3.bf16.msra.mxu1 %v1161_v0 }
  0x60   :  { %1065 = vmatprep.subr.bf16.mxu1 %v1291_v44 }
  0x61   :  { %1022 = vmatpush3.bf16.msra.mxu0 %v1151_v48 }
  0x62   :  { %1023 = vmatprep.subr.bf16.mxu0 %v1152_v49 }
  0x63   :  { %1066 = vmatpush3.bf16.msra.mxu1 %v1162_v1 }
  0x64   :  { %1067 = vmatprep.subr.bf16.mxu1 %v1291_v44 }
  0x65   :  { %1024 = vmatpush3.bf16.msra.mxu0 %v1153_v50 }
  0x66   :  { %1025 = vmatprep.subr.bf16.mxu0 %v1154_v51  ;;  %v962_v51 = vld [vmem:[%s1396_s6] ss:$0 sm:$0xff] }
  0x67   :  { %1068 = vmatpush3.bf16.msra.mxu1 %v1163_v2 }
  0x68   :  { %1069 = vmatprep.subr.bf16.mxu1 %v1291_v44 }
  0x69   :  { %1026 = vmatpush3.bf16.msra.mxu0 %v1155_v52 }
  0x6a   :  { %1027 = vmatprep.subr.bf16.mxu0 %v1156_v55 }
  0x6b   :  { %1070 = vmatpush3.bf16.msra.mxu1 %v1164_v3 }
  0x6c   :  { %1071 = vmatprep.subr.bf16.mxu1 %v1291_v44 }
  0x6d   :  { %1028 = vmatpush3.bf16.msra.mxu0 %v1157_v59 }
  0x6e   :  { %1029 = vmatprep.subr.bf16.mxu0 %v1158_v60 }
  0x6f   :  { %1072 = vmatpush3.bf16.msra.mxu1 %v1165_v4 }
  0x70   :  { %1073 = vmatprep.subr.bf16.mxu1 %v1291_v44 }
  0x71   :  { %1030 = vmatpush3.bf16.msra.mxu0 %v1159_v61 }
  0x72   :  { %1083 = vmatprep.subr.bf16.mxu0 %v1291_v44 }
  0x73   :  { %1074 = vmatpush3.bf16.msra.mxu1 %v1166_v5 }
  0x74   :  { %611 = vmatmul.mubr.bf16.vlgmr.msra.gmra.mxu0 %v92_v63  ;;  %1075 = vmatprep.subr.bf16.mxu1 %v1291_v44 }
  0x75   :  { %1099 = vmatprep.mubr.msk.bf16.mxu0 %vm1292_vm0, %v1291_v44  ;;  %1084 = vmatpush3.bf16.msra.mxu0 %v1169_v8 }
  0x76   :  { %1085 = vmatprep.subr.bf16.mxu0 %v1291_v44 }
  0x77   :  { %1076 = vmatpush3.bf16.msra.mxu1 %v1167_v6 }
  0x78   :  { %1077 = vmatprep.subr.bf16.mxu1 %v1291_v44 }
  0x79   :  { %1086 = vmatpush3.bf16.msra.mxu0 %v1170_v9 }
  0x7a   :  { %1087 = vmatprep.subr.bf16.mxu0 %v1291_v44 }
  0x7b   :  { %1078 = vmatpush3.bf16.msra.mxu1 %v1168_v7 }
  0x7d   :  { %1088 = vmatpush3.bf16.msra.mxu0 %v1171_v10 }
  0x7e   :  { %1089 = vmatprep.subr.bf16.mxu0 %v1291_v44 }
  0x81   :  { %1090 = vmatpush3.bf16.msra.mxu0 %v1172_v11 }
  0x82   :  { %1091 = vmatprep.subr.bf16.mxu0 %v1291_v44 }
  0x85   :  { %1092 = vmatpush3.bf16.msra.mxu0 %v1173_v12 }
  0x86   :  { %1093 = vmatprep.subr.bf16.mxu0 %v1291_v44 }
  0x89   :  { %1094 = vmatpush3.bf16.msra.mxu0 %v1174_v13 }
  0x8a   :  { %1095 = vmatprep.subr.bf16.mxu0 %v1291_v44 }
  0x8d   :  { %1096 = vmatpush3.bf16.msra.mxu0 %v1175_v40 }
  0x8e   :  { %1097 = vmatprep.subr.bf16.mxu0 %v1291_v44 }
  0x91   :  { %1098 = vmatpush3.bf16.msra.mxu0 %v1176_v41 }
 0x114   :  { %v987_v14 = vpop.f32.mrf.mxu0 }
 0x116   :  { %v988_v15 = vpop.f32.mrf.mxu0  ;;  %v1009_v16 = vpop.f32.mrf.mxu1 }
 0x117   :  { %v989_v26 = vadd.f32 %v988_v15, %v987_v14 }
 0x118   :  { %v990_v17 = vpop.f32.mrf.mxu0  ;;  %v1010_v18 = vpop.f32.mrf.mxu1 }
 0x119   :  { %v533_v28 = vadd.f32 %v989_v26, %v902_v27  ;;  %v1011_v29 = vadd.f32 %v1010_v18, %v1009_v16 }
 0x11a   :  { %v991_v19 = vpop.f32.mrf.mxu0  ;;  %v1012_v20 = vpop.f32.mrf.mxu1 }
 0x11b   :  { %v573_v32 = vadd.f32 %v1011_v29, %v533_v28 }
 0x11c   :  { %v1013_v21 = vpop.f32.mrf.mxu1 }
 0x11e   :  { %v652_v22 = vpop.f32.mrf.mxu1 }
 0x120   :  { %v1061_v23 = vpop.f32.mrf.mxu1 }
 0x122   :  { %v655_v24 = vpop.f32.mrf.mxu1 }
 0x124   :  { %v1062_v25 = vpop.f32.mrf.mxu1 }
 0x134   :  { %v1031_v30 = vpop.f32.mrf.mxu0 }
 0x136   :  { %v1032_v31 = vpop.f32.mrf.mxu0 }
 0x137   :  { %v1033_v33 = vadd.f32 %v1032_v31, %v1031_v30 }
 0x138   :  { %v1034_v34 = vpop.f32.mrf.mxu0 }
 0x139   :  { %v613_v35 = vadd.f32 %v1033_v33, %v573_v32 }
 0x13a   :  { %v1035_v36 = vpop.f32.mrf.mxu0 }
 0x13b   :  { %v653_v37 = vadd.f32 %v652_v22, %v613_v35 }
 0x13d   :  { %v658_v38 = vmax.f32 %v653_v37, 0.0 }
 0x13f   :  { %v659_v39 = vpack.c.bf16 %v658_v38, %v658_v38 }
 0x141   :  { %1080 = vmatmul.mubr.bf16.vlgmr.msra.gmra.mxu1 %v659_v39 }
 0x201   :  { %v765_v43 = vpop.f32.mrf.mxu1 }
 0x202   :  { %v766_v45 = vadd.f32 %v953_v42, %v765_v43 }
 0x203   :  { %v1081_v46 = vpop.f32.mrf.mxu1 }
 0x204   :  { %v771_v47 = vmax.f32 %v766_v45, 0.0 }
 0x205   :  { %v768_v48 = vpop.f32.mrf.mxu1 }
 0x206   :  { %v772_v49 = vpack.c.bf16 %v771_v47, %v771_v47 }
 0x207   :  { %v1082_v50 = vpop.f32.mrf.mxu1 }
 0x208   :  { %1100 = vmatmul.mubr.bf16.vlgmr.msra.gmra.mxu0 %v772_v49 }
 0x2c8   :  { %v878_v44 = vpop.f32.mrf.mxu0 }
 0x2c9   :  { %v879_v52 = vadd.f32 %v962_v51, %v878_v44 }
 0x2ca   :  { %v1101_v53 = vpop.f32.mrf.mxu0 }
 0x2cb   :  { %884 = vst [vmem:[#allocation10] sm:$0xff] %v879_v52 }
 0x2cc   :  { %v881_v54 = vpop.f32.mrf.mxu0 }
 0x2cd   :  { %1268 = shalt.err (!%p1265_p10)
}
 0x2ce   :  { %894 = dma.vmem_to_hbm [thread:$0]  %s892_s25, 128, %s1397_s7, [#allocation4]   ;;  %v1102_v55 = vpop.f32.mrf.mxu0 }
 0x2cf   :  { %1283 = dma.done.wait [#allocation4], 128  }
 0x2d0   :  { %1284 = vsyncadd [#allocation4], 4294967168 }
 0x2d1   :  { %898 = vsyncpa [#allocation3], 1 }
 0x2d2   :  { %899 = vsyncpa [#allocation6], 1 }
 0x2d3   :  { %900 = vsyncpa [#allocation9], 1 }
 0x2d4   :  { %901 = vsyncpa [#allocation4], 1 }

</bundles_post_ra>
